<compile_context>
chip_gen: v6e
topology: v6e:2x2x1
jax: 0.10.0
libtpu: 0.0.40
codegen_flags: <defaults>
</compile_context>

<pallas_src>
import functools

import numpy as np
import jax
import jax.numpy as jnp
from jax import lax
from jax.experimental import pallas as pl
from jax.experimental.pallas import tpu as pltpu

SCALE = 50          # nn.Upsample(scale_factor=50)
HIDDEN = 16         # pre1 output channels (undefined in reference __init__)
C_MID = 3           # pre2 output channels (densenet expects 3-channel input)
FEATURES = 1000     # densenet121 classifier output size
EMBED = 128         # embed_size (small stand-in for the default 1024)
PRELU_ALPHA = 0.25  # nn.PReLU() default init
TILE_P_MAX = 8192   # pixel-axis tile (multiple of 128), used once H*W grows


# ---------------------------------------------------------------------------
# Trace-time (numpy) constants: interpolation matrices -> pooling weights
# ---------------------------------------------------------------------------
def _interp_matrix(out_size, in_size):
    """align_corners=True bilinear interpolation matrix, shape (out, in)."""
    if in_size == 1:
        return np.ones((out_size, 1), np.float64)
    pos = np.arange(out_size, dtype=np.float64) * (in_size - 1) / (out_size - 1)
    lo = np.clip(np.floor(pos).astype(np.int64), 0, in_size - 2)
    frac = pos - lo
    m = np.zeros((out_size, in_size), np.float64)
    m[np.arange(out_size), lo] += 1.0 - frac
    m[np.arange(out_size), lo + 1] += frac
    return m


def _pool_weights(h, w, scale):
    """Vector p (H*W,) with  mean(upsample(x)) == sum_ij p[ij] * x[i, j]."""
    uh = _interp_matrix(h * scale, h).mean(axis=0)     # (H,)
    uw = _interp_matrix(w * scale, w).mean(axis=0)     # (W,)
    return np.outer(uh, uw).reshape(h * w).astype(np.float32)


# ---------------------------------------------------------------------------
# Kernel 1: per-pixel MLP (pre1+sigmoid) + fused upsample/pool accumulation
# ---------------------------------------------------------------------------
def _pixel_kernel(x_ref, w1_ref, b1_ref, wpool_ref, o_ref, acc_ref,
                  *, bf16_sigmoid):
    pt = pl.program_id(1)

    @pl.when(pt == 0)
    def _init():
        acc_ref[...] = jnp.zeros_like(acc_ref)

    # Channel-major per-pixel MLP: channels on sublanes, pixels on lanes.
    x = x_ref[0]                                                    # (Cin, TP)
    h = jnp.dot(w1_ref[...], x,
                preferred_element_type=jnp.float32) + b1_ref[...]   # (HID, TP)
    if bf16_sigmoid:
        # v6e/v7x lever: EUP sigmoid in bf16 (~2x packed throughput); the
        # weighted accumulation below stays in f32.
        h = jax.nn.sigmoid(h.astype(jnp.bfloat16))
    else:
        h = jax.nn.sigmoid(h)

    # VMEM-resident pool weights: one row per pixel tile (no HBM re-fetch).
    wp = wpool_ref[pl.ds(pt, 1), :]                                 # (1, TP)

    # Fused 50x bilinear upsample + global mean pool, with pre2 hoisted out:
    #   pooled = W2 @ (sum_p w_pool[p] * h[:, p]) + b2   (since sum(w_pool)==1)
    # VPU broadcast-multiply + XLU lane reduce (no M=1 MXU dot per tile).
    acc_ref[...] += jnp.sum(h * wp, axis=1, keepdims=True)          # (HID, 1)

    @pl.when(pt == pl.num_programs(1) - 1)
    def _finalize():
        o_ref[...] = acc_ref[...][None]                             # (1, HID, 1)


# ---------------------------------------------------------------------------
# Kernel 2: head, batched over N (pre2 -> backbone Linear -> PReLU -> embed)
# ---------------------------------------------------------------------------
def _head_kernel(hacc_ref, w2_ref, b2_ref, wb_ref, bb_ref, we_ref, be_ref,
                 o_ref, *, alpha):
    # pooled = hacc @ W2^T + b2   (contraction over HID, "NT" matmul)
    pooled = lax.dot_general(
        hacc_ref[...], w2_ref[...],
        dimension_numbers=(((1,), (1,)), ((), ())),
        preferred_element_type=jnp.float32) + b2_ref[...]           # (N, C_MID)
    # Surrogate backbone classifier.
    feats = jnp.dot(pooled, wb_ref[...],
                    preferred_element_type=jnp.float32) + bb_ref[...]
    feats = jnp.where(feats > 0, feats, alpha * feats)              # PReLU
    # Dropout2d(p=0.5) x2: identity in eval mode.
    o_ref[...] = jnp.dot(feats, we_ref[...],
                         preferred_element_type=jnp.float32) + be_ref[...]


# ---------------------------------------------------------------------------
# Wrapper
# ---------------------------------------------------------------------------
def encoder_dense_forward(images, params, *, tile_p_max=TILE_P_MAX,
                          compute_dtype=jnp.float32, bf16_sigmoid=False):
    N, Cin, H, W = images.shape
    HW = H * W

    # Pixel-axis tiling: big lane-dense tiles, rounded to 128, minimal padding.
    if HW <= tile_p_max:
        tp, n_pt = HW, 1
    else:
        n_pt = -(-HW // tile_p_max)
        tp = -(-HW // n_pt)
        tp = -(-tp // 128) * 128
        n_pt = -(-HW // tp)
    HW_pad = n_pt * tp

    # NCHW -> channel-major (N, Cin, HW): no transpose needed.
    x = images.reshape(N, Cin, HW).astype(compute_dtype)
    w_pool = _pool_weights(H, W, SCALE)                             # (HW,)
    # The pre2 hoist (pooled = W2 @ hacc + b2) requires sum(w_pool) == 1.
    assert abs(float(w_pool.sum()) - 1.0) < 1e-5, (
        "upsample+pool weights must sum to 1 (required by the pre2 hoist)")
    if HW_pad != HW:
        # Padded pixel columns get w_pool == 0 -> contribute exactly 0.
        x = jnp.pad(x, ((0, 0), (0, 0), (0, HW_pad - HW)))
        w_pool = np.pad(w_pool, (0, HW_pad - HW))
    w_pool = jnp.asarray(w_pool.reshape(n_pt, tp))

    hid = params["w1"].shape[0]
    emb = params["we"].shape[1]
    w1 = params["w1"].astype(compute_dtype)

    # ---- Kernel 1: pooled hidden activations, (N, HID, 1) -------------------
    # (If profiling shows exposed DMA with very large tiles, add
    #  pipeline_mode=pl.Buffered(3) on the x BlockSpec; constant weight specs
    #  could be Buffered(1) to reclaim VMEM on v7x.)
    hacc = pl.pallas_call(
        functools.partial(_pixel_kernel, bf16_sigmoid=bf16_sigmoid),
        grid=(N, n_pt),
        in_specs=[
            pl.BlockSpec((1, Cin, tp), lambda n, p: (n, 0, p)),   # x (per tile)
            pl.BlockSpec((hid, Cin), lambda n, p: (0, 0)),        # w1 (pre1.weight)
            pl.BlockSpec((hid, 1), lambda n, p: (0, 0)),          # b1
            pl.BlockSpec((n_pt, tp), lambda n, p: (0, 0)),        # w_pool (resident)
        ],
        out_specs=pl.BlockSpec((1, hid, 1), lambda n, p: (n, 0, 0)),
        out_shape=jax.ShapeDtypeStruct((N, hid, 1), jnp.float32),
        scratch_shapes=[pltpu.VMEM((hid, 1), jnp.float32)],
        compiler_params=pltpu.CompilerParams(
            dimension_semantics=("parallel", "arbitrary"),
            vmem_limit_bytes=32 * 1024 * 1024),
    )(x, w1, params["b1"], w_pool)

    pooled_h = hacc[:, :, 0]                                        # (N, HID)

    # ---- Kernel 2: head, batched over N (everything fits in VMEM) ----------
    out = pl.pallas_call(
        functools.partial(_head_kernel, alpha=PRELU_ALPHA),
        out_shape=jax.ShapeDtypeStruct((N, emb), jnp.float32),
    )(pooled_h, params["w2"], params["b2"].reshape(1, -1),
      params["wb"], params["bb"], params["we"], params["be"])
    return out


# ---------------------------------------------------------------------------
# Pure-JAX reference (materializes the upsample; validates both fusions)
# ---------------------------------------------------------------------------
def _reference_forward(images, params):
    hp = lax.Precision.HIGHEST
    N, Cin, H, W = images.shape
    x = images.transpose(0, 2, 3, 1)                               # permute(0,2,3,1)
    h = jax.nn.sigmoid(
        jnp.einsum('nhwc,oc->nhwo', x, params["w1"], precision=hp)
        + params["b1"][:, 0])
    pre = (jnp.einsum('nhwo,po->nhwp', h, params["w2"], precision=hp)
           + params["b2"][:, 0])
    pre = pre.transpose(0, 3, 1, 2)                                # permute(0,3,1,2)
    wh = jnp.asarray(_interp_matrix(H * SCALE, H), jnp.float32)
    ww = jnp.asarray(_interp_matrix(W * SCALE, W), jnp.float32)
    up = jnp.einsum('ai,ncij,bj->ncab', wh, pre, ww, precision=hp)
    pooled = up.mean(axis=(2, 3))                                  # surrogate backbone pool
    feats = jnp.dot(pooled, params["wb"], precision=hp) + params["bb"]
    feats = jnp.where(feats > 0, feats, PRELU_ALPHA * feats)
    return jnp.dot(feats, params["we"], precision=hp) + params["be"]


# ---------------------------------------------------------------------------
if __name__ == "__main__":
    N, Cin, H, W = 2, 8, 4, 4

    key = jax.random.PRNGKey(0)
    keys = jax.random.split(key, 9)
    images = jax.random.normal(keys[0], (N, Cin, H, W), jnp.float32)

    # Weights kept in PyTorch (out, in) layout for pre1/pre2; head weights in
    # (in, out) layout (i.e. already transposed nn.Linear weights).
    params = {
        "w1": 0.1 * jax.random.normal(keys[1], (HIDDEN, Cin), jnp.float32),
        "b1": 0.1 * jax.random.normal(keys[2], (HIDDEN, 1), jnp.float32),
        "w2": 0.1 * jax.random.normal(keys[3], (C_MID, HIDDEN), jnp.float32),
        "b2": 0.1 * jax.random.normal(keys[4], (C_MID, 1), jnp.float32),
        "wb": 0.1 * jax.random.normal(keys[5], (C_MID, FEATURES), jnp.float32),
        "bb": 0.1 * jax.random.normal(keys[6], (1, FEATURES), jnp.float32),
        "we": 0.05 * jax.random.normal(keys[7], (FEATURES, EMBED), jnp.float32),
        "be": 0.05 * jax.random.normal(keys[8], (1, EMBED), jnp.float32),
    }

    ref = _reference_forward(images, params)

    # Default (f32) path.
    out = jax.block_until_ready(jax.jit(encoder_dense_forward)(images, params))
    assert out.shape == (N, EMBED), out.shape
    assert out.dtype == jnp.float32
    err = float(jnp.max(jnp.abs(out - ref)))
    assert err < 2e-3, f"f32 path mismatch vs reference: max abs err = {err}"

    # bf16 compute path (v5e: bf16 input stream; v6e/v7x: bf16 EUP sigmoid);
    # accumulation stays f32, validated at a looser tolerance.
    fwd_bf16 = jax.jit(functools.partial(encoder_dense_forward,
                                         compute_dtype=jnp.bfloat16,
                                         bf16_sigmoid=True))
    out_bf16 = jax.block_until_ready(fwd_bf16(images, params))
    err_bf16 = float(jnp.max(jnp.abs(out_bf16 - ref)))
    assert err_bf16 < 2e-2, f"bf16 path mismatch vs reference: max abs err = {err_bf16}"

    print("KERNEL_OK")
</pallas_src>

<mosaic_0001>
module attributes {stable_mosaic.version = 11 : i64} {
  func.func @_pixel_kernel(%arg0: i32, %arg1: i32, %arg2: memref<1x8x16xf32, #tpu.memory_space<vmem>>, %arg3: memref<16x8xf32, #tpu.memory_space<vmem>>, %arg4: memref<16x1xf32, #tpu.memory_space<vmem>>, %arg5: memref<1x16xf32, #tpu.memory_space<vmem>>, %arg6: memref<1x16x1xf32, #tpu.memory_space<vmem>>, %arg7: memref<16x1xf32, #tpu.memory_space<vmem>>) attributes {dimension_semantics = [#tpu.dimension_semantics<parallel>, #tpu.dimension_semantics<arbitrary>], iteration_bounds = array<i64: 2, 1>, scalar_prefetch = 0 : i64, scratch_operands = 1 : i64, tpu.core_type = #tpu.core_type<tc>, window_params = [{transform_indices = @transform_0, window_bounds = array<i64: 1, 8, 16>}, {pipeline_mode = #tpu.pipeline_mode<synchronous>, transform_indices = @transform_1, window_bounds = array<i64: 16, 8>}, {pipeline_mode = #tpu.pipeline_mode<synchronous>, transform_indices = @transform_2, window_bounds = array<i64: 16, 1>}, {pipeline_mode = #tpu.pipeline_mode<synchronous>, transform_indices = @transform_3, window_bounds = array<i64: 1, 16>}, {transform_indices = @transform_4, window_bounds = array<i64: 1, 16, 1>}]} {
    %c0_i32 = arith.constant 0 : i32
    %0 = arith.cmpi eq, %arg1, %c0_i32 : i32
    %1 = arith.extui %0 : i1 to i32
    %c0_i32_0 = arith.constant 0 : i32
    %2 = arith.cmpi ne, %1, %c0_i32_0 : i32
    scf.if %2 {
      %cst_16 = arith.constant 0.000000e+00 : f32
      %27 = vector.broadcast %cst_16 : f32 to vector<16x1xf32>
      %c0_17 = arith.constant 0 : index
      %c0_18 = arith.constant 0 : index
      %28 = vector.load %arg7[%c0_17, %c0_18] : memref<16x1xf32, #tpu.memory_space<vmem>>, vector<16x1xf32>
      tpu.vector_store %arg7[%c0_17, %c0_18], %27 {strides = array<i32>} : memref<16x1xf32, #tpu.memory_space<vmem>>, vector<16x1xf32>,
    } else {
    }
    %c0 = arith.constant 0 : index
    %c0_1 = arith.constant 0 : index
    %c0_2 = arith.constant 0 : index
    %3 = vector.load %arg2[%c0, %c0_1, %c0_2] : memref<1x8x16xf32, #tpu.memory_space<vmem>>, vector<1x8x16xf32>
    %4 = vector.shape_cast %3 : vector<1x8x16xf32> to vector<8x16xf32>
    %c0_3 = arith.constant 0 : index
    %c0_4 = arith.constant 0 : index
    %5 = vector.load %arg3[%c0_3, %c0_4] : memref<16x8xf32, #tpu.memory_space<vmem>>, vector<16x8xf32>
    %cst = arith.constant dense<0.000000e+00> : vector<16x16xf32>
    %6 = tpu.matmul %5, %4, %cst {dimension_numbers = #tpu.dot_dimension_numbers<[1], [0], [0], [1], [0, 0, 1, 1], [], []>} : vector<16x8xf32>, vector<8x16xf32>, vector<16x16xf32> -> vector<16x16xf32>
    %c0_5 = arith.constant 0 : index
    %c0_6 = arith.constant 0 : index
    %7 = vector.load %arg4[%c0_5, %c0_6] : memref<16x1xf32, #tpu.memory_space<vmem>>, vector<16x1xf32>
    %8 = vector.broadcast %7 : vector<16x1xf32> to vector<16x16xf32>
    %9 = arith.addf %6, %8 : vector<16x16xf32>
    %10 = arith.negf %9 : vector<16x16xf32>
    %11 = math.exp %10 : vector<16x16xf32>
    %cst_7 = arith.constant 1.000000e+00 : f32
    %12 = vector.broadcast %cst_7 : f32 to vector<16x16xf32>
    %13 = arith.addf %12, %11 : vector<16x16xf32>
    %14 = arith.divf %12, %13 : vector<16x16xf32>
    %15 = arith.index_cast %arg1 : i32 to index
    %c0_8 = arith.constant 0 : index
    %16 = vector.load %arg5[%15, %c0_8] : memref<1x16xf32, #tpu.memory_space<vmem>>, vector<1x16xf32>
    %c0_9 = arith.constant 0 : index
    %c0_10 = arith.constant 0 : index
    %17 = vector.load %arg7[%c0_9, %c0_10] : memref<16x1xf32, #tpu.memory_space<vmem>>, vector<16x1xf32>
    %18 = vector.broadcast %16 : vector<1x16xf32> to vector<16x16xf32>
    %19 = arith.mulf %14, %18 : vector<16x16xf32>
    %cst_11 = arith.constant dense<0.000000e+00> : vector<16xf32>
    %20 = vector.multi_reduction <add>, %19, %cst_11 [1] : vector<16x16xf32> to vector<16xf32>
    %21 = vector.shape_cast %20 : vector<16xf32> to vector<16x1xf32>
    %22 = arith.addf %17, %21 : vector<16x1xf32>
    %c0_12 = arith.constant 0 : index
    %c0_13 = arith.constant 0 : index
    %23 = vector.load %arg7[%c0_12, %c0_13] : memref<16x1xf32, #tpu.memory_space<vmem>>, vector<16x1xf32>
    tpu.vector_store %arg7[%c0_12, %c0_13], %22 {strides = array<i32>} : memref<16x1xf32, #tpu.memory_space<vmem>>, vector<16x1xf32>,
    %c0_i32_14 = arith.constant 0 : i32
    %24 = arith.cmpi eq, %arg1, %c0_i32_14 : i32
    %25 = arith.extui %24 : i1 to i32
    %c0_i32_15 = arith.constant 0 : i32
    %26 = arith.cmpi ne, %25, %c0_i32_15 : i32
    scf.if %26 {
      %c0_16 = arith.constant 0 : index
      %c0_17 = arith.constant 0 : index
      %27 = vector.load %arg7[%c0_16, %c0_17] : memref<16x1xf32, #tpu.memory_space<vmem>>, vector<16x1xf32>
      %28 = vector.shape_cast %27 : vector<16x1xf32> to vector<1x16x1xf32>
      %c0_18 = arith.constant 0 : index
      %c0_19 = arith.constant 0 : index
      %c0_20 = arith.constant 0 : index
      %29 = vector.load %arg6[%c0_18, %c0_19, %c0_20] : memref<1x16x1xf32, #tpu.memory_space<vmem>>, vector<1x16x1xf32>
      tpu.vector_store %arg6[%c0_18, %c0_19, %c0_20], %28 {strides = array<i32>} : memref<1x16x1xf32, #tpu.memory_space<vmem>>, vector<1x16x1xf32>,
    } else {
    }
    return
  }
  func.func @transform_0(%arg0: i32, %arg1: i32) -> (i32, i32, i32) {
    %c0_i32 = arith.constant 0 : i32
    %c0_i32_0 = arith.constant 0 : i32
    return %arg0, %c0_i32, %arg1 : i32, i32, i32
  }
  func.func @transform_1(%arg0: i32, %arg1: i32) -> (i32, i32) {
    %c0_i32 = arith.constant 0 : i32
    %c0_i32_0 = arith.constant 0 : i32
    %c0_i32_1 = arith.constant 0 : i32
    return %c0_i32, %c0_i32_0 : i32, i32
  }
  func.func @transform_2(%arg0: i32, %arg1: i32) -> (i32, i32) {
    %c0_i32 = arith.constant 0 : i32
    %c0_i32_0 = arith.constant 0 : i32
    %c0_i32_1 = arith.constant 0 : i32
    return %c0_i32, %c0_i32_0 : i32, i32
  }
  func.func @transform_3(%arg0: i32, %arg1: i32) -> (i32, i32) {
    %c0_i32 = arith.constant 0 : i32
    %c0_i32_0 = arith.constant 0 : i32
    %c0_i32_1 = arith.constant 0 : i32
    return %c0_i32, %c0_i32_0 : i32, i32
  }
  func.func @transform_4(%arg0: i32, %arg1: i32) -> (i32, i32, i32) {
    %c0_i32 = arith.constant 0 : i32
    %c0_i32_0 = arith.constant 0 : i32
    %c0_i32_1 = arith.constant 0 : i32
    return %arg0, %c0_i32, %c0_i32_0 : i32, i32, i32
  }
}

module attributes {stable_mosaic.version = 11 : i64} {
  func.func @_head_kernel(%arg0: memref<2x16xf32, #tpu.memory_space<vmem>>, %arg1: memref<3x16xf32, #tpu.memory_space<vmem>>, %arg2: memref<1x3xf32, #tpu.memory_space<vmem>>, %arg3: memref<3x1000xf32, #tpu.memory_space<vmem>>, %arg4: memref<1x1000xf32, #tpu.memory_space<vmem>>, %arg5: memref<1000x128xf32, #tpu.memory_space<vmem>>, %arg6: memref<1x128xf32, #tpu.memory_space<vmem>>, %arg7: memref<2x128xf32, #tpu.memory_space<vmem>>) attributes {dimension_semantics = [], scalar_prefetch = 0 : i64, scratch_operands = 0 : i64, tpu.core_type = #tpu.core_type<tc>} {
    %c0 = arith.constant 0 : index
    %c0_0 = arith.constant 0 : index
    %0 = vector.load %arg0[%c0, %c0_0] : memref<2x16xf32, #tpu.memory_space<vmem>>, vector<2x16xf32>
    %c0_1 = arith.constant 0 : index
    %c0_2 = arith.constant 0 : index
    %1 = vector.load %arg1[%c0_1, %c0_2] : memref<3x16xf32, #tpu.memory_space<vmem>>, vector<3x16xf32>
    %cst = arith.constant dense<0.000000e+00> : vector<2x3xf32>
    %2 = tpu.matmul %0, %1, %cst {dimension_numbers = #tpu.dot_dimension_numbers<[1], [1], [0], [0], [0, 0, 1, 0], [], []>} : vector<2x16xf32>, vector<3x16xf32>, vector<2x3xf32> -> vector<2x3xf32>
    %c0_3 = arith.constant 0 : index
    %c0_4 = arith.constant 0 : index
    %3 = vector.load %arg2[%c0_3, %c0_4] : memref<1x3xf32, #tpu.memory_space<vmem>>, vector<1x3xf32>
    %4 = vector.broadcast %3 : vector<1x3xf32> to vector<2x3xf32>
    %5 = arith.addf %2, %4 : vector<2x3xf32>
    %c0_5 = arith.constant 0 : index
    %c0_6 = arith.constant 0 : index
    %6 = vector.load %arg3[%c0_5, %c0_6] : memref<3x1000xf32, #tpu.memory_space<vmem>>, vector<3x1000xf32>
    %cst_7 = arith.constant dense<0.000000e+00> : vector<2x1000xf32>
    %7 = tpu.matmul %5, %6, %cst_7 {dimension_numbers = #tpu.dot_dimension_numbers<[1], [0], [0], [1], [0, 0, 1, 1], [], []>} : vector<2x3xf32>, vector<3x1000xf32>, vector<2x1000xf32> -> vector<2x1000xf32>
    %c0_8 = arith.constant 0 : index
    %c0_9 = arith.constant 0 : index
    %8 = vector.load %arg4[%c0_8, %c0_9] : memref<1x1000xf32, #tpu.memory_space<vmem>>, vector<1x1000xf32>
    %9 = vector.broadcast %8 : vector<1x1000xf32> to vector<2x1000xf32>
    %10 = arith.addf %7, %9 : vector<2x1000xf32>
    %cst_10 = arith.constant 0.000000e+00 : f32
    %11 = vector.broadcast %cst_10 : f32 to vector<2x1000xf32>
    %12 = arith.cmpf ogt, %10, %11 : vector<2x1000xf32>
    %cst_11 = arith.constant 2.500000e-01 : f32
    %13 = vector.broadcast %cst_11 : f32 to vector<2x1000xf32>
    %14 = arith.mulf %13, %10 : vector<2x1000xf32>
    %15 = arith.select %12, %10, %14 : vector<2x1000xi1>, vector<2x1000xf32>
    %c0_12 = arith.constant 0 : index
    %c0_13 = arith.constant 0 : index
    %16 = vector.load %arg5[%c0_12, %c0_13] : memref<1000x128xf32, #tpu.memory_space<vmem>>, vector<1000x128xf32>
    %cst_14 = arith.constant dense<0.000000e+00> : vector<2x128xf32>
    %17 = tpu.matmul %15, %16, %cst_14 {dimension_numbers = #tpu.dot_dimension_numbers<[1], [0], [0], [1], [0, 0, 1, 1], [], []>} : vector<2x1000xf32>, vector<1000x128xf32>, vector<2x128xf32> -> vector<2x128xf32>
    %c0_15 = arith.constant 0 : index
    %c0_16 = arith.constant 0 : index
    %18 = vector.load %arg6[%c0_15, %c0_16] : memref<1x128xf32, #tpu.memory_space<vmem>>, vector<1x128xf32>
    %19 = vector.broadcast %18 : vector<1x128xf32> to vector<2x128xf32>
    %20 = arith.addf %17, %19 : vector<2x128xf32>
    %c0_17 = arith.constant 0 : index
    %c0_18 = arith.constant 0 : index
    %21 = vector.load %arg7[%c0_17, %c0_18] : memref<2x128xf32, #tpu.memory_space<vmem>>, vector<2x128xf32>
    tpu.vector_store %arg7[%c0_17, %c0_18], %20 {strides = array<i32>} : memref<2x128xf32, #tpu.memory_space<vmem>>, vector<2x128xf32>,
    return
  }
}

</mosaic_0001>

<bundles_post_ra>
// kernel: encoder_dense_forward.2
= control target key start
LH: loop header
LB: loop body
LE: loop exit
PB: predicated region body
PF: predicated region fallthrough
CT: control target
= control target key end

     0   :  { %s542_s15 = smov 0   ;;  %s544_s16 = smov 0   ;;  %s600_s0 = inlined_call_operand.vmem [shape: f32[2,8,16], index: 0, kind: input, shape index: {}]   ;;  %s601_s1 = inlined_call_operand.vmem [shape: f32[16,8], index: 1, kind: input, shape index: {}]   ;;  %s602_s2 = inlined_call_operand.vmem [shape: f32[16,1], index: 2, kind: input, shape index: {}]   ;;  %s603_s3 = inlined_call_operand.vmem [shape: f32[1,16], index: 3, kind: input, shape index: {}]   ;;  %s604_s4 = inlined_call_operand.vmem [shape: f32[2,16,1], index: 4, kind: output, shape index: {}]  }
   0x1   :  { %s546_s17 = smov 0  }
   0x2 LB: > { %s26_s18 = sadd.s32 1, %s509_s16  ;;  %p436_p0 = scmp.ge.s32.totalorder %s513_s17, 1  ;;  %s513_s17 = sphi %s546_s17, %s14_s17   ;;  %s509_s16 = sphi %s544_s16, %s606_s16   ;;  %s505_s15 = sphi %s542_s15, %s605_s15  }
   0x3   : > { %p28_p1 = scmp.ge.s32.totalorder %s26_s18, 2  ;;  %p178_p2 = scmp.lt.s32.totalorder %s513_s17, 3 }
   0x5   : > { %s608_s18 = smov (%p28_p1, %s26_s18), 0  ;;  %p179_p3 = pnand %p436_p0, %p178_p2 }
   0x6   : > { %p206_p4 = scmp.lt.s32.totalorder (!%p179_p3), %s505_s15, 1 }
   0x7   : > { %182 = sbr.rel (%p179_p3) target bundleno = 403 (0x193), region = 36 }
   0xc   : > { %v226_v0 = vld [vmem:[%s601_s1] sm:$0xff]  ;;  %vm240_vm0 = vcmask 64512   ;;  %v515_v2 = vmov 0   ;;  %s610_s15 = smov (!%p206_p4, %s505_s15), 1  ;;  %v229_v3 = vld [vmem:[%s602_s2 + $0x8] sm:$0xff]  ;;  %vm222_vm1 = vcmask 7168  }
   0xd   : > { %v228_v1 = vld [vmem:[%s602_s2] sm:$0xff]  ;;  %453 = vmatprep.mubr.msk.f32.mxu0 %vm240_vm0, %v226_v0  ;;  %482 = vset.pattern.permute.xlu0 %v515_v2  ;;  %s437_s25 = sshll.u32 %s610_s15, 3  ;;  %v227_v5 = vld [vmem:[%s601_s1 + $0x8] sm:$0xff]  ;;  %v516_v6 = vmov 0.0   ;;  %vm346_vm2 = vcmask 130048   ;;  %s447_s7 = sshll.u32 %s610_s15, 4 }
   0xe   : > { %232 = vperm.xlu0 %482, %v228_v1   ;;  %s212_s28 = scalar_lea.vmem %s600_s0, %s437_s25  ;;  %223 = vst.msk [vmem:[#allocation2] sm:$0xff] %vm222_vm1, %v516_v6  ;;  %224 = vst.msk [vmem:[#allocation2 + $0x8] sm:$0xff] %vm222_vm1, %v516_v6  ;;  %v444_v21 = vld [vmem:[%s603_s3] ss:$0 sm:$0xff]  ;;  %s217_s10 = scalar_lea.vmem %s604_s4, %s447_s7 }
   0xf   : > { %v225_v4 = vld [vmem:[%s212_s28] sm:$0xff] }
  0x10   : > { %451 = vmatprep.subr.mxu0 %v225_v4 }
  0x11   : > { %452 = vmatpush3.msra.mxu0 %v225_v4 }
  0x12   : > { %237 = vperm.xlu0 %482, %v229_v3   ;;  %454 = vmatmul.mubr.msk.f32.vlgmr.msra.gmra.mxu0 %vm240_vm0, %v227_v5 }
  0x15   : > { %v336_v26 = vld [vmem:[#allocation2] sm:$0xff]  ;;  %v337_v29 = vld [vmem:[#allocation2 + $0x8] sm:$0xff] }
  0x89   : > { %v233_v7 = vpop.permute.xlu0 %232 }
  0x8d   : > { %v238_v8 = vpop.permute.xlu0 %237 }
  0xd2   : > { %v455_v9 = vpop.f32.mrf.mxu0 }
  0xd3   : > { %v319_v10 = vadd.f32 %v455_v9, %v238_v8 }
  0xd4   : > { %v313_v11 = vpop.f32.mrf.mxu0 }
  0xd5   : > { %v443_v12 = vmul.f32 -1.442695, %v319_v10  ;;  %v314_v13 = vadd.f32 %v313_v11, %v233_v7 }
  0xd7   : > { %483 = vpow2.f32 %v443_v12  ;;  %v442_v14 = vmul.f32 -1.442695, %v314_v13 }
  0xd9   : > { %485 = vpow2.f32 %v442_v14 }
  0xe4   : > { %v484_v15 = vpop.eup %483 }
  0xe5   : > { %v329_v16 = vadd.f32 1.0, %v484_v15 }
  0xe6   : > { %v486_v17 = vpop.eup %485 }
  0xe7   : > { %v328_v18 = vadd.f32 1.0, %v486_v17  ;;  %487 = vrcp.f32 %v329_v16 }
  0xe9   : > { %489 = vrcp.f32 %v328_v18 }
  0xf4   : > { %v488_v19 = vpop.eup %487 }
  0xf5   : > { %v345_v24 = vmul.f32 %v488_v19, %v444_v21 }
  0xf6   : > { %v490_v20 = vpop.eup %489 }
  0xf7   : > { %v344_v22 = vmul.f32 %v490_v20, %v444_v21  ;;  %v350_v25 = vsel %vm346_vm2, %v345_v24, 0.0 }
  0xf9   : > { %v347_v23 = vsel %vm346_vm2, %v344_v22, 0.0 }
  0xfa   : > { %348 = vadd.xlane.f32.xlu1 %v347_v23 }
  0xfe   : > { %351 = vadd.xlane.f32.xlu1 %v350_v25 }
 0x183   : > { %v349_v27 = vpop.xlane.xlu1 %348 }
 0x184   : > { %v353_v28 = vadd.f32 %v349_v27, %v336_v26 }
 0x186   : > { %356 = vst.msk [vmem:[#allocation2] sm:$0xff] %vm222_vm1, %v353_v28 }
 0x187   : > { %v352_v30 = vpop.xlane.xlu1 %351 }
 0x188   : > { %v354_v31 = vadd.f32 %v352_v30, %v337_v29 }
 0x18a   : > { %357 = vst.msk [vmem:[#allocation2 + $0x8] sm:$0xff] %vm222_vm1, %v354_v31 }
 0x18d   : > { %v361_v32 = vld [vmem:[#allocation2] sm:$0xff] }
 0x18e   : > { %363 = vst.msk [vmem:[%s217_s10] sm:$0xff] %vm222_vm1, %v361_v32 }
 0x191   : > { %v362_v33 = vld [vmem:[#allocation2 + $0x8] sm:$0xff] }
 0x192   : > { %364 = vst.msk [vmem:[%s217_s10 + $0x8] sm:$0xff] %vm222_vm1, %v362_v33 }
 0x193 PF: > { %s14_s17 = sadd.s32 1, %s513_s17   ;;  %s605_s15 = smov %s509_s16 }
 0x194   : > { %p11_p5 = scmp.ge.s32.totalorder %s14_s17, 4   ;;  %s606_s16 = smov %s608_s18 }
 0x196   :  { %13 = sbr.rel (!%p11_p5) target bundleno = 2 (0x2), region = 75 }

// kernel: encoder_dense_forward.3
= control target key start
LH: loop header
LB: loop body
LE: loop exit
PB: predicated region body
PF: predicated region fallthrough
CT: control target
= control target key end

     0   :  { %12 = vsyncpa [#allocation3], 0  ;;  %s1280_s0 = inlined_call_operand.vmem [shape: f32[2,16], index: 0, kind: input, shape index: {}]   ;;  %s1281_s1 = inlined_call_operand.vmem [shape: f32[3,16], index: 1, kind: input, shape index: {}]   ;;  %s1282_s2 = inlined_call_operand.vmem [shape: f32[1,3], index: 2, kind: input, shape index: {}]   ;;  %s1283_s3 = inlined_call_operand.vmem [shape: f32[3,1000], index: 3, kind: input, shape index: {}]   ;;  %s1284_s4 = inlined_call_operand.vmem [shape: f32[1,1000], index: 4, kind: input, shape index: {}]   ;;  %s1285_s5 = inlined_call_operand.hbm [shape: f32[1000,128], index: 5, kind: input, shape index: {}]   ;;  %s1286_s6 = inlined_call_operand.vmem [shape: f32[1,128], index: 6, kind: input, shape index: {}]   ;;  %s1287_s7 = inlined_call_operand.hbm [shape: f32[2,128], index: 7, kind: output, shape index: {}]  }
   0x1   :  { %13 = vsyncpa [#allocation4], 0  ;;  %s1125_s24 = smov [#allocation2]  }
   0x2   :  { %s29_s25 = sshll.u32 %s1125_s24, 4  ;;  %s30_s25 = int_to_ptr.vmem [resolvable:$true] %s29_s25 }
   0x3   :  { %s1089_s26 = scalar_lea.vmem %s30_s25, 16000  ;;  %p1094_p1 = scmp.lt.s32.totalorder %s30_s25, %s30_s25 }
   0x4   :  { %p1090_p0 = scmp.ne.s32.totalorder %s30_s25, %s1089_s26  ;;  %p1095_p2 = scmp.lt.s32.totalorder %s1089_s26, %s1089_s26 }
   0x6   :  { %p1096_p3 = por %p1095_p2, %p1094_p1 }
   0x8   :  { %p1097_p4 = pnand %p1096_p3, %p1090_p0 }
   0xa   :  { %1100 = shalt.err (!%p1097_p4)
}
   0xb   :  { %s1126_s27 = smov 128   ;;  %s1127_s28 = smov 8  }
   0xc   :  { %35 = dma.hbm_to_vmem [thread:$0]  %s1285_s5, 16000, %s30_s25, [#allocation3], %s1126_s27, %s1126_s27, %s1127_s28  }
   0xd   :  { %1121 = dma.done.wait [#allocation3], 16000  }
   0xe   :  { %1122 = vsyncadd [#allocation3], 4294951296  ;;  %v1128_v0 = vmov 0.0   ;;  %vm1129_vm0 = vmmov 0   ;;  %vm50_vm1 = vcmask 130048   ;;  %vm185_vm2 = vcmask 1042432  }
   0xf   :  { %1066 = vmatprep.subr.mxu0 %v1128_v0  ;;  %1068 = vmatprep.mubr.msk.f32.mxu0 %vm1129_vm0, %v1128_v0  ;;  %v42_v1 = vld [vmem:[%s1281_s1] sm:$0x7]  ;;  %v128_v5 = vld [vmem:[%s1283_s3 + $0x8] sm:$0x77]  ;;  %v573_v7 = vld [vmem:[#allocation2 + $0x1f8] sm:$0xff]  ;;  %vm181_vm3 = vcmask 23552  }
  0x10   :  { %v127_v2 = vld [vmem:[%s1283_s3] sm:$0x77]  ;;  %1067 = vmatpush3.xpose.msk.msra.mxu0 %vm50_vm1, %v42_v1  ;;  %v178_v6 = vcombine.high %v128_v5, %v128_v5  ;;  %996 = vmatprep.subr.mxu1 %v573_v7  ;;  %v557_v8 = vld [vmem:[#allocation2 + $0x178] sm:$0xff]  ;;  %v572_v9 = vld [vmem:[#allocation2 + $0x1f0] sm:$0xff]  ;;  %vm642_vm10 = vcmask 850944   ;;  %s1130_s20 = smov [#allocation5]  }
  0x11   :  { %v41_v3 = vld [vmem:[%s1280_s0] sm:$0x3]  ;;  %v177_v4 = vcombine.high %v127_v2, %v127_v2  ;;  %997 = vmatpush3.msra.mxu1 %v557_v8  ;;  %v556_v10 = vld [vmem:[#allocation2 + $0x170] sm:$0xff]  ;;  %v571_v11 = vld [vmem:[#allocation2 + $0x1e8] sm:$0xff]  ;;  %s933_s21 = sshll.u32 %s1130_s20, 4  ;;  %s934_s21 = int_to_ptr.vmem [resolvable:$true] %s933_s21 }
  0x12   :  { %998 = vmatprep.subr.mxu1 %v572_v9  ;;  %v555_v12 = vld [vmem:[#allocation2 + $0x168] sm:$0xff]  ;;  %v570_v13 = vld [vmem:[#allocation2 + $0x1e0] sm:$0xff]  ;;  %v569_v15 = vld [vmem:[#allocation2 + $0x1d8] sm:$0xff]  ;;  %s1101_s22 = scalar_lea.vmem %s934_s21, 32  ;;  %p1106_p6 = scmp.lt.s32.totalorder %s934_s21, %s934_s21 }
  0x13   :  { %945 = vmatprep.subr.msk.mxu0 %vm185_vm2, %v177_v4  ;;  %1069 = vmatmul.mubr.msk.f32.vlgmr.msra.gmra.mxu0 %vm50_vm1, %v41_v3  ;;  %v554_v14 = vld [vmem:[#allocation2 + $0x160] sm:$0xff]  ;;  %v553_v16 = vld [vmem:[#allocation2 + $0x158] sm:$0xff]  ;;  %v568_v17 = vld [vmem:[#allocation2 + $0x1d0] sm:$0xff]  ;;  %p1102_p5 = scmp.ne.s32.totalorder %s934_s21, %s1101_s22  ;;  %p1107_p7 = scmp.lt.s32.totalorder %s1101_s22, %s1101_s22 }
  0x14   :  { %946 = vmatpush1.msk.msra.mxu0 %vm185_vm2, %v127_v2  ;;  %266 = vmatprep.mubr.f32.mxu0 %v1128_v0  ;;  %v552_v18 = vld [vmem:[#allocation2 + $0x150] sm:$0xff]  ;;  %v567_v19 = vld [vmem:[#allocation2 + $0x1c8] sm:$0xff]  ;;  %v566_v21 = vld [vmem:[#allocation2 + $0x1c0] sm:$0xff] }
  0x15   :  { %948 = vmatprep.subr.msk.mxu0 %vm185_vm2, %v178_v6  ;;  %999 = vmatpush3.msra.mxu1 %v556_v10  ;;  %v551_v20 = vld [vmem:[#allocation2 + $0x148] sm:$0xff]  ;;  %v550_v22 = vld [vmem:[#allocation2 + $0x140] sm:$0xff]  ;;  %v565_v23 = vld [vmem:[#allocation2 + $0x1b8] sm:$0xff]  ;;  %v133_v6 = vlaneseq  ;;  %p1108_p8 = por %p1107_p7, %p1106_p6 }
  0x16   :  { %1000 = vmatprep.subr.mxu1 %v571_v11  ;;  %v549_v24 = vld [vmem:[#allocation2 + $0x138] sm:$0xff]  ;;  %v564_v25 = vld [vmem:[#allocation2 + $0x1b0] sm:$0xff]  ;;  %v942_v27 = vld [vmem:[%s1282_s2] ss:$0 sm:$0xff] }
  0x17   :  { %1001 = vmatpush3.msra.mxu1 %v555_v12  ;;  %v548_v26 = vld [vmem:[#allocation2 + $0x130] sm:$0xff]  ;;  %v130_v33 = vld [vmem:[%s1283_s3 + $0x18] sm:$0x77]  ;;  %v539_v39 = vld [vmem:[#allocation2 + $0xe8] sm:$0xff]  ;;  %p1109_p9 = pnand %p1108_p8, %p1102_p5 }
  0x18   :  { %1002 = vmatprep.subr.mxu1 %v570_v13  ;;  %v129_v28 = vld [vmem:[%s1283_s3 + $0x10] sm:$0x77]  ;;  %v180_v34 = vcombine.high %v130_v33, %v130_v33  ;;  %v541_v35 = vld [vmem:[#allocation2 + $0xf8] sm:$0xff]  ;;  %v523_v40 = vld [vmem:[#allocation2 + $0x68] sm:$0xff] }
  0x19   :  { %1003 = vmatpush3.msra.mxu1 %v554_v14  ;;  %v179_v31 = vcombine.high %v129_v28, %v129_v28  ;;  %v525_v36 = vld [vmem:[#allocation2 + $0x78] sm:$0xff]  ;;  %v540_v37 = vld [vmem:[#allocation2 + $0xf0] sm:$0xff]  ;;  %v538_v41 = vld [vmem:[#allocation2 + $0xe0] sm:$0xff] }
  0x1a   :  { %1004 = vmatprep.subr.mxu1 %v569_v15  ;;  %v524_v38 = vld [vmem:[#allocation2 + $0x70] sm:$0xff]  ;;  %v522_v42 = vld [vmem:[#allocation2 + $0x60] sm:$0xff]  ;;  %v537_v43 = vld [vmem:[#allocation2 + $0xd8] sm:$0xff]  ;;  %v1213_v15 = vshrl.u32 %v133_v6, 7 }
  0x1b   :  { %1005 = vmatpush3.msra.mxu1 %v553_v16  ;;  %v521_v44 = vld [vmem:[#allocation2 + $0x58] sm:$0xff]  ;;  %v536_v45 = vld [vmem:[#allocation2 + $0xd0] sm:$0xff]  ;;  %v535_v47 = vld [vmem:[#allocation2 + $0xc8] sm:$0xff] }
  0x1c   :  { %1006 = vmatprep.subr.mxu1 %v568_v17  ;;  %v520_v46 = vld [vmem:[#allocation2 + $0x50] sm:$0xff]  ;;  %v519_v48 = vld [vmem:[#allocation2 + $0x48] sm:$0xff]  ;;  %v534_v49 = vld [vmem:[#allocation2 + $0xc0] sm:$0xff] }
  0x1d   :  { %1007 = vmatpush3.msra.mxu1 %v552_v18  ;;  %v518_v50 = vld [vmem:[#allocation2 + $0x40] sm:$0xff]  ;;  %v533_v51 = vld [vmem:[#allocation2 + $0xb8] sm:$0xff]  ;;  %v532_v53 = vld [vmem:[#allocation2 + $0xb0] sm:$0xff]  ;;  %v159_v18 = vsub.s32 6, %v1213_v15 }
  0x1e   :  { %1008 = vmatprep.subr.mxu1 %v567_v19  ;;  %v517_v52 = vld [vmem:[#allocation2 + $0x38] sm:$0xff]  ;;  %v516_v54 = vld [vmem:[#allocation2 + $0x30] sm:$0xff]  ;;  %v531_v55 = vld [vmem:[#allocation2 + $0xa8] sm:$0xff] }
  0x1f   :  { %1009 = vmatpush3.msra.mxu1 %v551_v20  ;;  %v515_v56 = vld [vmem:[#allocation2 + $0x28] sm:$0xff]  ;;  %v530_v57 = vld [vmem:[#allocation2 + $0xa0] sm:$0xff]  ;;  %v529_v59 = vld [vmem:[#allocation2 + $0x98] sm:$0xff] }
  0x20   :  { %1010 = vmatprep.subr.mxu1 %v566_v21  ;;  %v514_v58 = vld [vmem:[#allocation2 + $0x20] sm:$0xff]  ;;  %v563_v60 = vld [vmem:[#allocation2 + $0x1a8] sm:$0xff]  ;;  %v513_v61 = vld [vmem:[#allocation2 + $0x18] sm:$0xff] }
  0x21   :  { %1011 = vmatpush3.msra.mxu1 %v550_v22  ;;  %v547_v62 = vld [vmem:[#allocation2 + $0x128] sm:$0xff]  ;;  %v528_v63 = vld [vmem:[#allocation2 + $0x90] sm:$0xff]  ;;  %v562_v1 = vld [vmem:[#allocation2 + $0x1a0] sm:$0xff]  ;;  %v135_v22 = vsub.s32 0, %v1213_v15 }
  0x22   :  { %1012 = vmatprep.subr.mxu1 %v565_v23  ;;  %v512_v2 = vld [vmem:[#allocation2 + $0x10] sm:$0xff]  ;;  %v546_v3 = vld [vmem:[#allocation2 + $0x120] sm:$0xff]  ;;  %v527_v4 = vld [vmem:[#allocation2 + $0x88] sm:$0xff]  ;;  %v139_v23 = vsub.s32 1, %v1213_v15 }
  0x23   :  { %1013 = vmatpush3.msra.mxu1 %v549_v24  ;;  %v511_v7 = vld [vmem:[#allocation2 + $0x8] sm:$0xff]  ;;  %v545_v8 = vld [vmem:[#allocation2 + $0x118] sm:$0xff]  ;;  %v526_v9 = vld [vmem:[#allocation2 + $0x80] sm:$0xff] }
  0x24   :  { %1014 = vmatprep.subr.mxu1 %v564_v25  ;;  %v560_v10 = vld [vmem:[#allocation2 + $0x190] sm:$0xff]  ;;  %v510_v11 = vld [vmem:[#allocation2] sm:$0xff]  ;;  %v559_v13 = vld [vmem:[#allocation2 + $0x188] sm:$0xff]  ;;  %v143_v25 = vsub.s32 2, %v1213_v15 }
  0x25   :  { %1015 = vmatpush3.msra.mxu1 %v548_v26  ;;  %v544_v12 = vld [vmem:[#allocation2 + $0x110] sm:$0xff]  ;;  %v605_v14 = vld [vmem:[#allocation2 + $0x2f8] sm:$0xff]  ;;  %v543_v16 = vld [vmem:[#allocation2 + $0x108] sm:$0xff] }
  0x26   :  { %1016 = vmatprep.subr.mxu1 %v563_v60  ;;  %v558_v17 = vld [vmem:[#allocation2 + $0x180] sm:$0xff]  ;;  %v619_v6 = vld [vmem:[#allocation2 + $0x368] sm:$0xff] }
  0x27   :  { %1017 = vmatpush3.msra.mxu1 %v547_v62  ;;  %v1219_v19 = vld [vmem:[%s1284_s4] sm:$0xff] }
  0x28   :  { %1018 = vmatprep.subr.mxu1 %v562_v1  ;;  %v542_v20 = vld [vmem:[#allocation2 + $0x100] sm:$0xff]  ;;  %v1222_v21 = vrot.slane %v1219_v19, %v159_v18  ;;  %v136_v24 = vrot.slane %v1219_v19, %v135_v22  ;;  %v140_v26 = vrot.slane %v1219_v19, %v139_v23  ;;  %v616_v18 = vld [vmem:[#allocation2 + $0x350] sm:$0xff]  ;;  %v581_v22 = vld [vmem:[#allocation2 + $0x238] sm:$0xff] }
  0x29   :  { %1019 = vmatpush3.msra.mxu1 %v546_v3  ;;  %v602_v60 = vld [vmem:[#allocation2 + $0x2e0] sm:$0xff]  ;;  %v615_v23 = vld [vmem:[#allocation2 + $0x348] sm:$0xff] }
  0x2a   :  { %v586_v62 = vld [vmem:[#allocation2 + $0x260] sm:$0xff] }
  0xd3   :  { %v123_v29 = vpop.f32.mrf.mxu0 }
  0xd4   :  { %v124_v30 = vadd.f32 %v942_v27, %v123_v29  ;;  %v147_v27 = vsub.s32 3, %v1213_v15 }
  0xd5   :  { %v1070_v32 = vpop.f32.mrf.mxu0 }
  0xd6   :  { %947 = vmatmul.mubr.msk.f32.vlgmr.msra.gmra.mxu0 %vm181_vm3, %v124_v30 }
  0xd7   :  { %949 = vmatpush1.msk.msra.mxu0 %vm185_vm2, %v128_v5  ;;  %337 = vmatprep.mubr.f32.mxu0 %v1128_v0  ;;  %v561_v5 = vld [vmem:[#allocation2 + $0x198] sm:$0xff] }
  0xd8   :  { %951 = vmatprep.subr.msk.mxu0 %vm185_vm2, %v179_v31  ;;  %1020 = vmatprep.subr.mxu1 %v561_v5  ;;  %v585_v5 = vld [vmem:[#allocation2 + $0x258] sm:$0xff] }
  0xd9   :  { %1021 = vmatpush3.msra.mxu1 %v545_v8 }
  0xda   :  { %950 = vmatmul.mubr.msk.f32.vlgmr.msra.gmra.mxu0 %vm181_vm3, %v124_v30  ;;  %1022 = vmatprep.subr.mxu1 %v560_v10  ;;  %v618_v10 = vld [vmem:[#allocation2 + $0x360] sm:$0xff] }
  0xdb   :  { %952 = vmatpush1.msk.msra.mxu0 %vm185_vm2, %v129_v28  ;;  %408 = vmatprep.mubr.f32.mxu0 %v1128_v0 }
  0xdc   :  { %954 = vmatprep.subr.msk.mxu0 %vm185_vm2, %v180_v34  ;;  %1023 = vmatpush3.msra.mxu1 %v544_v12  ;;  %v155_v34 = vsub.s32 5, %v1213_v15 }
  0xdd   :  { %1024 = vmatprep.subr.mxu1 %v559_v13  ;;  %v583_v13 = vld [vmem:[#allocation2 + $0x248] sm:$0xff] }
  0xde   :  { %953 = vmatmul.mubr.msk.f32.vlgmr.msra.gmra.mxu0 %vm181_vm3, %v124_v30  ;;  %1025 = vmatpush3.msra.mxu1 %v543_v16  ;;  %v598_v16 = vld [vmem:[#allocation2 + $0x2c0] sm:$0xff] }
  0xdf   :  { %955 = vmatpush1.msk.msra.mxu0 %vm185_vm2, %v130_v33  ;;  %479 = vmatprep.mubr.f32.mxu0 %v1128_v0  ;;  %v148_v33 = vrot.slane %v1219_v19, %v147_v27  ;;  %v614_v27 = vld [vmem:[#allocation2 + $0x340] sm:$0xff] }
  0xe0   :  { %961 = vmatprep.subr.mxu0 %v541_v35  ;;  %1026 = vmatprep.subr.mxu1 %v558_v17  ;;  %v582_v17 = vld [vmem:[#allocation2 + $0x240] sm:$0xff] }
  0xe1   :  { %1027 = vmatpush3.msra.mxu1 %v542_v20  ;;  %v597_v20 = vld [vmem:[#allocation2 + $0x2b8] sm:$0xff] }
  0xe2   :  { %956 = vmatmul.mubr.msk.f32.vlgmr.msra.gmra.mxu0 %vm181_vm3, %v124_v30  ;;  %856 = vmatprep.subr.mxu1 %v1128_v0  ;;  %v144_v30 = vrot.slane %v1219_v19, %v143_v25  ;;  %v596_v25 = vld [vmem:[#allocation2 + $0x2b0] sm:$0xff] }
  0xe3   :  { %962 = vmatpush3.msra.mxu0 %v525_v36 }
  0xe4   :  { %963 = vmatprep.subr.mxu0 %v540_v37 }
  0xe5   :  { %964 = vmatpush3.msra.mxu0 %v524_v38 }
  0xe6   :  { %965 = vmatprep.subr.mxu0 %v539_v39 }
  0xe7   :  { %966 = vmatpush3.msra.mxu0 %v523_v40 }
  0xe8   :  { %967 = vmatprep.subr.mxu0 %v538_v41 }
  0xe9   :  { %968 = vmatpush3.msra.mxu0 %v522_v42  ;;  %v589_v42 = vld [vmem:[#allocation2 + $0x278] sm:$0xff] }
  0xea   :  { %969 = vmatprep.subr.mxu0 %v537_v43  ;;  %v156_v43 = vrot.slane %v1219_v19, %v155_v34  ;;  %v593_v34 = vld [vmem:[#allocation2 + $0x298] sm:$0xff] }
  0xeb   :  { %970 = vmatpush3.msra.mxu0 %v521_v44  ;;  %v163_v44 = vsub.s32 7, %v1213_v15 }
  0xec   :  { %971 = vmatprep.subr.mxu0 %v536_v45 }
  0xed   :  { %972 = vmatpush3.msra.mxu0 %v520_v46 }
  0xee   :  { %973 = vmatprep.subr.mxu0 %v535_v47 }
  0xef   :  { %974 = vmatpush3.msra.mxu0 %v519_v48  ;;  %v604_v48 = vld [vmem:[#allocation2 + $0x2f0] sm:$0xff] }
  0xf0   :  { %975 = vmatprep.subr.mxu0 %v534_v49  ;;  %v588_v49 = vld [vmem:[#allocation2 + $0x270] sm:$0xff] }
  0xf1   :  { %976 = vmatpush3.msra.mxu0 %v518_v50 }
  0xf2   :  { %977 = vmatprep.subr.mxu0 %v533_v51 }
  0xf3   :  { %978 = vmatpush3.msra.mxu0 %v517_v52  ;;  %v603_v52 = vld [vmem:[#allocation2 + $0x2e8] sm:$0xff] }
  0xf4   :  { %979 = vmatprep.subr.mxu0 %v532_v53 }
  0xf5   :  { %980 = vmatpush3.msra.mxu0 %v516_v54 }
  0xf6   :  { %981 = vmatprep.subr.mxu0 %v531_v55  ;;  %v587_v55 = vld [vmem:[#allocation2 + $0x268] sm:$0xff] }
  0xf7   :  { %982 = vmatpush3.msra.mxu0 %v515_v56  ;;  %v621_v56 = vld [vmem:[#allocation2 + $0x378] sm:$0xff] }
  0xf8   :  { %983 = vmatprep.subr.mxu0 %v530_v57  ;;  %v164_v57 = vrot.slane %v1219_v19, %v163_v44  ;;  %v590_v44 = vld [vmem:[#allocation2 + $0x280] sm:$0xff] }
  0xf9   :  { %984 = vmatpush3.msra.mxu0 %v514_v58 }
  0xfa   :  { %985 = vmatprep.subr.mxu0 %v529_v59 }
  0xfb   :  { %986 = vmatpush3.msra.mxu0 %v513_v61 }
  0xfc   :  { %987 = vmatprep.subr.mxu0 %v528_v63  ;;  %v620_v63 = vld [vmem:[#allocation2 + $0x370] sm:$0xff] }
  0xfd   :  { %988 = vmatpush3.msra.mxu0 %v512_v2  ;;  %v601_v2 = vld [vmem:[#allocation2 + $0x2d8] sm:$0xff] }
  0xfe   :  { %989 = vmatprep.subr.mxu0 %v527_v4 }
  0xff   :  { %990 = vmatpush3.msra.mxu0 %v511_v7  ;;  %v600_v7 = vld [vmem:[#allocation2 + $0x2d0] sm:$0xff] }
 0x100   :  { %991 = vmatprep.subr.mxu0 %v526_v9  ;;  %v584_v9 = vld [vmem:[#allocation2 + $0x250] sm:$0xff] }
 0x101   :  { %992 = vmatpush3.msra.mxu0 %v510_v11  ;;  %v599_v11 = vld [vmem:[#allocation2 + $0x2c8] sm:$0xff] }
 0x102   :  { %1031 = vmatprep.subr.mxu0 %v605_v14  ;;  %v617_v14 = vld [vmem:[#allocation2 + $0x358] sm:$0xff] }
 0x196   :  { %v268_v28 = vpop.f32.mrf.mxu0 }
 0x197   :  { %v269_v29 = vadd.f32 %v268_v28, %v136_v24  ;;  %v151_v24 = vsub.s32 4, %v1213_v15  ;;  %v595_v28 = vld [vmem:[#allocation2 + $0x2a8] sm:$0xff]  ;;  %v594_v15 = vld [vmem:[#allocation2 + $0x2a0] sm:$0xff] }
 0x198   :  { %v270_v31 = vpop.f32.mrf.mxu0 }
 0x199   :  { %v271_v32 = vadd.f32 %v270_v31, %v140_v26  ;;  %v494_v35 = vmul.f32 0.25, %v269_v29  ;;  %vm486_vm4 = vcmp.gt.f32.partialorder %v269_v29, 0.0  ;;  %v580_v26 = vld [vmem:[#allocation2 + $0x230] sm:$0xff]  ;;  %v152_v31 = vrot.slane %v1219_v19, %v151_v24 }
 0x19a   :  { %v339_v36 = vpop.f32.mrf.mxu0  ;;  %v592_v19 = vld [vmem:[#allocation2 + $0x290] sm:$0xff] }
 0x19b   :  { %v495_v37 = vmul.f32 0.25, %v271_v32  ;;  %v340_v38 = vadd.f32 %v339_v36, %v144_v30  ;;  %vm487_vm5 = vcmp.gt.f32.partialorder %v271_v32, 0.0  ;;  %v502_v47 = vsel %vm486_vm4, %v269_v29, %v494_v35  ;;  %v579_v29 = vld [vmem:[#allocation2 + $0x228] sm:$0xff]  ;;  %v613_v30 = vld [vmem:[#allocation2 + $0x338] sm:$0xff] }
 0x19c   :  { %v341_v39 = vpop.f32.mrf.mxu0  ;;  %v577_v35 = vld [vmem:[#allocation2 + $0x218] sm:$0xff]  ;;  %v611_v36 = vld [vmem:[#allocation2 + $0x328] sm:$0xff] }
 0x19d   :  { %v342_v40 = vadd.f32 %v341_v39, %v148_v33  ;;  %v503_v41 = vsel %vm487_vm5, %v271_v32, %v495_v37  ;;  %v496_v45 = vmul.f32 0.25, %v340_v38  ;;  %vm488_vm7 = vcmp.gt.f32.partialorder %v340_v38, 0.0  ;;  %v578_v32 = vld [vmem:[#allocation2 + $0x220] sm:$0xff]  ;;  %v612_v33 = vld [vmem:[#allocation2 + $0x330] sm:$0xff] }
 0x19e   :  { %v1236_v46 = vpop.f32.mrf.mxu0  ;;  %710 = vmatprep.mubr.f32.mxu0 %v503_v41  ;;  %v610_v39 = vld [vmem:[#allocation2 + $0x320] sm:$0xff]  ;;  %v575_v41 = vld [vmem:[#allocation2 + $0x208] sm:$0xff] }
 0x19f   :  { %711 = vmatmul.mubr.f32.vlgmr.msra.gmra.mxu0 %v502_v47  ;;  %vm489_vm6 = vcmp.gt.f32.partialorder %v342_v40, 0.0  ;;  %v497_v50 = vmul.f32 0.25, %v342_v40  ;;  %v504_v59 = vsel %vm488_vm7, %v340_v38, %v496_v45  ;;  %v411_v37 = vadd.f32 %v1236_v46, %v152_v31  ;;  %v576_v38 = vld [vmem:[#allocation2 + $0x210] sm:$0xff]  ;;  %v574_v45 = vld [vmem:[#allocation2 + $0x200] sm:$0xff]  ;;  %v607_v47 = vld [vmem:[#allocation2 + $0x308] sm:$0xff] }
 0x1a0   :  { %1032 = vmatpush3.msra.mxu0 %v589_v42  ;;  %v412_v51 = vpop.f32.mrf.mxu0  ;;  %v609_v42 = vld [vmem:[#allocation2 + $0x318] sm:$0xff]  ;;  %v608_v46 = vld [vmem:[#allocation2 + $0x310] sm:$0xff] }
 0x1a1   :  { %v413_v53 = vadd.f32 %v412_v51, %v156_v43  ;;  %1033 = vmatprep.subr.mxu0 %v604_v48  ;;  %v505_v54 = vsel %vm489_vm6, %v342_v40, %v497_v50  ;;  %v591_v40 = vld [vmem:[#allocation2 + $0x288] sm:$0xff]  ;;  %v498_v43 = vmul.f32 0.25, %v411_v37  ;;  %vm490_vm11 = vcmp.gt.f32.partialorder %v411_v37, 0.0  ;;  %v634_v50 = vld [vmem:[#allocation2 + $0x3e0] sm:$0xff]  ;;  %v633_v51 = vld [vmem:[#allocation2 + $0x3d8] sm:$0xff] }
 0x1a2   :  { %1034 = vmatpush3.msra.mxu0 %v588_v49  ;;  %v1239_v58 = vpop.f32.mrf.mxu0  ;;  %780 = vmatprep.mubr.f32.mxu1 %v505_v54  ;;  %v606_v49 = vld [vmem:[#allocation2 + $0x300] sm:$0xff] }
 0x1a3   :  { %v499_v61 = vmul.f32 0.25, %v413_v53  ;;  %1035 = vmatprep.subr.mxu0 %v603_v52  ;;  %781 = vmatmul.mubr.f32.vlgmr.msra.gmra.mxu1 %v504_v59  ;;  %vm491_vm8 = vcmp.gt.f32.partialorder %v413_v53, 0.0  ;;  %v506_v48 = vsel %vm490_vm11, %v411_v37, %v498_v43  ;;  %v632_v52 = vld [vmem:[#allocation2 + $0x3d0] sm:$0xff]  ;;  %v630_v54 = vld [vmem:[#allocation2 + $0x3c0] sm:$0xff] }
 0x1a4   :  { %1036 = vmatpush3.msra.mxu0 %v587_v55  ;;  %857 = vmatpush1.msra.mxu1 %v621_v56  ;;  %v483_v1 = vpop.f32.mrf.mxu0  ;;  %v629_v55 = vld [vmem:[#allocation2 + $0x3b8] sm:$0xff]  ;;  %v628_v56 = vld [vmem:[#allocation2 + $0x3b0] sm:$0xff]  ;;  %v626_v59 = vld [vmem:[#allocation2 + $0x3a0] sm:$0xff] }
 0x1a5   :  { %v484_v3 = vadd.f32 %v483_v1, %v164_v57  ;;  %1037 = vmatprep.subr.mxu0 %v602_v60  ;;  %858 = vmatprep.subr.mxu1 %v1128_v0  ;;  %v507_v4 = vsel %vm491_vm8, %v413_v53, %v499_v61  ;;  %v631_v53 = vld [vmem:[#allocation2 + $0x3c8] sm:$0xff]  ;;  %v625_v60 = vld [vmem:[#allocation2 + $0x398] sm:$0xff]  ;;  %v482_v61 = vadd.f32 %v1239_v58, %v1222_v21 }
 0x1a6   :  { %1038 = vmatpush3.msra.mxu0 %v586_v62  ;;  %859 = vmatpush1.msra.mxu1 %v620_v63  ;;  %v627_v57 = vld [vmem:[#allocation2 + $0x3a8] sm:$0xff]  ;;  %v624_v62 = vld [vmem:[#allocation2 + $0x390] sm:$0xff] }
 0x1a7   :  { %vm493_vm9 = vcmp.gt.f32.partialorder %v484_v3, 0.0  ;;  %v501_v8 = vmul.f32 0.25, %v484_v3  ;;  %1039 = vmatprep.subr.mxu0 %v601_v2  ;;  %850 = vmatprep.mubr.f32.mxu0 %v507_v4  ;;  %v623_v63 = vld [vmem:[#allocation2 + $0x388] sm:$0xff]  ;;  %v500_v1 = vmul.f32 0.25, %v482_v61  ;;  %vm492_vm12 = vcmp.gt.f32.partialorder %v482_v61, 0.0  ;;  %v622_v2 = vld [vmem:[#allocation2 + $0x380] sm:$0xff] }
 0x1a8   :  { %860 = vmatprep.subr.mxu1 %v1128_v0  ;;  %1040 = vmatpush3.msra.mxu0 %v585_v5 }
 0x1a9   :  { %861 = vmatpush1.msra.mxu1 %v619_v6  ;;  %1041 = vmatprep.subr.mxu0 %v600_v7  ;;  %v509_v12 = vsel %vm493_vm9, %v484_v3, %v501_v8  ;;  %v508_v3 = vsel %vm492_vm12, %v482_v61, %v500_v1  ;;  %v957_v8 = vld [vmem:[%s1286_s6] ss:$0 sm:$0xff] }
 0x1aa   :  { %862 = vmatprep.subr.mxu1 %v1128_v0  ;;  %1042 = vmatpush3.msra.mxu0 %v584_v9 }
 0x1ab   :  { %863 = vmatpush1.msra.mxu1 %v618_v10  ;;  %1043 = vmatprep.subr.mxu0 %v599_v11 }
 0x1ac   :  { %864 = vmatprep.subr.mxu1 %v1128_v0  ;;  %958 = vmatprep.mubr.msk.f32.mxu1 %vm642_vm10, %v509_v12 }
 0x1ad   :  { %1044 = vmatpush3.msra.mxu0 %v583_v13  ;;  %865 = vmatpush1.msra.mxu1 %v617_v14 }
 0x1ae   :  { %1045 = vmatprep.subr.mxu0 %v598_v16  ;;  %866 = vmatprep.subr.mxu1 %v1128_v0 }
 0x1af   :  { %1046 = vmatpush3.msra.mxu0 %v582_v17  ;;  %867 = vmatpush1.msra.mxu1 %v616_v18 }
 0x1b0   :  { %1047 = vmatprep.subr.mxu0 %v597_v20  ;;  %868 = vmatprep.subr.mxu1 %v1128_v0 }
 0x1b1   :  { %1048 = vmatpush3.msra.mxu0 %v581_v22  ;;  %869 = vmatpush1.msra.mxu1 %v615_v23 }
 0x1b2   :  { %1049 = vmatprep.subr.mxu0 %v596_v25  ;;  %870 = vmatprep.subr.mxu1 %v1128_v0 }
 0x1b3   :  { %1050 = vmatpush3.msra.mxu0 %v580_v26  ;;  %871 = vmatpush1.msra.mxu1 %v614_v27 }
 0x1b4   :  { %1051 = vmatprep.subr.mxu0 %v595_v28  ;;  %872 = vmatprep.subr.mxu1 %v1128_v0 }
 0x1b5   :  { %1052 = vmatpush3.msra.mxu0 %v579_v29  ;;  %873 = vmatpush1.msra.mxu1 %v613_v30 }
 0x1b6   :  { %1053 = vmatprep.subr.mxu0 %v594_v15  ;;  %874 = vmatprep.subr.mxu1 %v1128_v0 }
 0x1b7   :  { %1054 = vmatpush3.msra.mxu0 %v578_v32  ;;  %875 = vmatpush1.msra.mxu1 %v612_v33 }
 0x1b8   :  { %1055 = vmatprep.subr.mxu0 %v593_v34  ;;  %876 = vmatprep.subr.mxu1 %v1128_v0 }
 0x1b9   :  { %1056 = vmatpush3.msra.mxu0 %v577_v35  ;;  %877 = vmatpush1.msra.mxu1 %v611_v36 }
 0x1ba   :  { %1057 = vmatprep.subr.mxu0 %v592_v19  ;;  %878 = vmatprep.subr.mxu1 %v1128_v0 }
 0x1bb   :  { %1058 = vmatpush3.msra.mxu0 %v576_v38  ;;  %879 = vmatpush1.msra.mxu1 %v610_v39 }
 0x1bc   :  { %1059 = vmatprep.subr.mxu0 %v591_v40  ;;  %880 = vmatprep.subr.mxu1 %v1128_v0 }
 0x1bd   :  { %1060 = vmatpush3.msra.mxu0 %v575_v41  ;;  %881 = vmatpush1.msra.mxu1 %v609_v42 }
 0x1be   :  { %1061 = vmatprep.subr.mxu0 %v590_v44  ;;  %882 = vmatprep.subr.mxu1 %v1128_v0 }
 0x1bf   :  { %1062 = vmatpush3.msra.mxu0 %v574_v45  ;;  %883 = vmatpush1.msra.mxu1 %v608_v46 }
 0x1c0   :  { %851 = vmatmul.mubr.f32.vlgmr.msra.gmra.mxu0 %v506_v48  ;;  %884 = vmatprep.subr.mxu1 %v1128_v0 }
 0x1c1   :  { %885 = vmatpush1.msra.mxu1 %v607_v47 }
 0x1c2   :  { %886 = vmatprep.subr.mxu1 %v1128_v0 }
 0x1c3   :  { %887 = vmatpush1.msra.mxu1 %v606_v49 }
 0x1c4   :  { %894 = vmatprep.subr.mxu1 %v1128_v0 }
 0x1c5   :  { %895 = vmatpush2.msra.mxu1 %v634_v50 }
 0x1c6   :  { %896 = vmatprep.subr.mxu1 %v1128_v0 }
 0x1c7   :  { %897 = vmatpush2.msra.mxu1 %v633_v51 }
 0x1c8   :  { %898 = vmatprep.subr.mxu1 %v1128_v0 }
 0x1c9   :  { %899 = vmatpush2.msra.mxu1 %v632_v52 }
 0x1ca   :  { %900 = vmatprep.subr.mxu1 %v1128_v0 }
 0x1cb   :  { %901 = vmatpush2.msra.mxu1 %v631_v53 }
 0x1cc   :  { %902 = vmatprep.subr.mxu1 %v1128_v0 }
 0x1cd   :  { %903 = vmatpush2.msra.mxu1 %v630_v54 }
 0x1ce   :  { %904 = vmatprep.subr.mxu1 %v1128_v0 }
 0x1cf   :  { %905 = vmatpush2.msra.mxu1 %v629_v55 }
 0x1d0   :  { %906 = vmatprep.subr.mxu1 %v1128_v0 }
 0x1d1   :  { %907 = vmatpush2.msra.mxu1 %v628_v56 }
 0x1d2   :  { %908 = vmatprep.subr.mxu1 %v1128_v0 }
 0x1d3   :  { %909 = vmatpush2.msra.mxu1 %v627_v57 }
 0x1d4   :  { %910 = vmatprep.subr.mxu1 %v1128_v0 }
 0x1d5   :  { %911 = vmatpush2.msra.mxu1 %v626_v59 }
 0x1d6   :  { %912 = vmatprep.subr.mxu1 %v1128_v0 }
 0x1d7   :  { %913 = vmatpush2.msra.mxu1 %v625_v60 }
 0x1d8   :  { %914 = vmatprep.subr.mxu1 %v1128_v0 }
 0x1d9   :  { %915 = vmatpush2.msra.mxu1 %v624_v62 }
 0x1da   :  { %916 = vmatprep.subr.mxu1 %v1128_v0 }
 0x1db   :  { %917 = vmatpush2.msra.mxu1 %v623_v63 }
 0x1dc   :  { %918 = vmatprep.subr.mxu1 %v1128_v0 }
 0x1dd   :  { %919 = vmatpush2.msra.mxu1 %v622_v2 }
 0x1de   :  { %921 = vmatmul.mubr.f32.vlgmr.msra.gmra.mxu1 %v508_v3 }
 0x25f   :  { %v993_v21 = vpop.f32.mrf.mxu0 }
 0x261   :  { %v994_v58 = vpop.f32.mrf.mxu0 }
 0x262   :  { %v995_v7 = vadd.f32 %v994_v58, %v993_v21 }
 0x263   :  { %v1028_v4 = vpop.f32.mrf.mxu1 }
 0x264   :  { %v713_v11 = vadd.f32 %v995_v7, %v957_v8 }
 0x265   :  { %v1029_v6 = vpop.f32.mrf.mxu1 }
 0x266   :  { %v1030_v10 = vadd.f32 %v1029_v6, %v1028_v4 }
 0x268   :  { %v783_v13 = vadd.f32 %v1030_v10, %v713_v11 }
 0x280   :  { %v1063_v5 = vpop.f32.mrf.mxu0 }
 0x282   :  { %v1064_v9 = vpop.f32.mrf.mxu0 }
 0x283   :  { %v1065_v12 = vadd.f32 %v1064_v9, %v1063_v5 }
 0x285   :  { %v853_v0 = vadd.f32 %v1065_v12, %v783_v13 }
 0x29e   :  { %v922_v14 = vpop.f32.mrf.mxu1 }
 0x29f   :  { %v923_v16 = vadd.f32 %v922_v14, %v853_v0 }
 0x2a0   :  { %v924_v17 = vpop.f32.mrf.mxu1 }
 0x2a1   :  { %926 = vst [vmem:[#allocation5] sm:$0x3] %v923_v16 }
 0x2a2   :  { %1112 = shalt.err (!%p1109_p9)
}
 0x2a3   :  { %936 = dma.vmem_to_hbm [thread:$0]  %s934_s21, 32, %s1287_s7, [#allocation4]  }
 0x2a4   :  { %1123 = dma.done.wait [#allocation4], 32  }
 0x2a5   :  { %1124 = vsyncadd [#allocation4], 4294967264 }
 0x2a6   :  { %940 = vsyncpa [#allocation3], 1 }
 0x2a7   :  { %941 = vsyncpa [#allocation4], 1 }

</bundles_post_ra>
